<compile_context>
chip_gen: v6e
topology: v6e:2x2x1
jax: 0.10.0
libtpu: 0.0.40
codegen_flags: <defaults>
</compile_context>

<pallas_src>
import math
from functools import partial

import jax
import jax.numpy as jnp
from jax.experimental import pallas as pl
from jax.experimental.pallas import tpu as pltpu

LN_EPS = 1e-5
RMS_EPS = 1e-5
VMEM_LIMIT = 48 * 1024 * 1024  # fits v7x's 64 MiB physical VMEM with headroom


# ------------------------------ tile helpers -------------------------------- #

def _row_tile(m, pref=512):
    """Row tile: full rows if small, else `pref` (multiple of 8, ragged ok)."""
    return m if m <= pref else pref


def _col_tile(n, pref=512):
    """Output-column tile: full if small, else `pref` (multiple of 128, ragged ok)."""
    return n if n <= pref else pref


def _divisor_tile(n, pref=512, mult=128):
    """Largest multiple of `mult` <= pref that exactly divides n, else n (full)."""
    if n <= pref:
        return n
    t = (pref // mult) * mult
    while t >= mult:
        if n % t == 0:
            return t
        t -= mult
    return n


def _head_group(nheads, dk, hd):
    """Heads per mix block: lane-dense (multiples of 128) last dims, <=128 lanes."""
    for g in range(nheads, 0, -1):
        if nheads % g:
            continue
        ok_size = (g * dk <= 128) and (g * hd <= 128)
        ok_align = (g == nheads) or (g * dk % 128 == 0 and g * hd % 128 == 0)
        if ok_size and ok_align:
            return g
    return nheads  # fall back to one full-width block (always legal)


# ----------------------------- Pallas kernels ------------------------------- #

def layernorm_kernel(x_ref, w_ref, b_ref, o_ref):
    x = x_ref[...].astype(jnp.float32)
    mean = jnp.mean(x, axis=-1, keepdims=True)
    var = jnp.mean(jnp.square(x - mean), axis=-1, keepdims=True)
    xn = (x - mean) * jax.lax.rsqrt(var + LN_EPS)
    o_ref[...] = (xn * w_ref[...].astype(jnp.float32)
                  + b_ref[...].astype(jnp.float32)).astype(o_ref.dtype)


def add_layernorm_kernel(x_ref, r_ref, w_ref, b_ref, o_ref):
    x = x_ref[...].astype(jnp.float32) + r_ref[...].astype(jnp.float32)
    mean = jnp.mean(x, axis=-1, keepdims=True)
    var = jnp.mean(jnp.square(x - mean), axis=-1, keepdims=True)
    xn = (x - mean) * jax.lax.rsqrt(var + LN_EPS)
    o_ref[...] = (xn * w_ref[...].astype(jnp.float32)
                  + b_ref[...].astype(jnp.float32)).astype(o_ref.dtype)


def matmul_bias_kernel(x_ref, w_ref, b_ref, o_ref, acc_ref):
    # K-tiled matmul with f32 accumulator; K is the last ("arbitrary") grid axis.
    @pl.when(pl.program_id(2) == 0)
    def _init():
        acc_ref[...] = jnp.zeros_like(acc_ref)

    acc_ref[...] += jnp.dot(x_ref[...], w_ref[...],
                            preferred_element_type=jnp.float32)

    @pl.when(pl.program_id(2) == pl.num_programs(2) - 1)
    def _finalize():
        o_ref[...] = (acc_ref[...] + b_ref[...].astype(jnp.float32)).astype(o_ref.dtype)


def dwconv_silu_kernel(x_ref, w_ref, b_ref, m_ref, o_ref, *, kconv):
    # Causal depthwise conv + SiLU + pad-token masking, all in VMEM (no HBM pad).
    x = x_ref[0].astype(jnp.float32)                       # (S, tc)
    seqlen = x.shape[0]
    row = jax.lax.broadcasted_iota(jnp.int32, (seqlen, 1), 0)
    acc = x * w_ref[kconv - 1:kconv, :].astype(jnp.float32)  # shift-0 tap
    for k in range(kconv - 1):
        shift = kconv - 1 - k                              # static 1..K-1
        xs = pltpu.roll(x, shift=shift, axis=0)            # xs[t] = x[t - shift]
        xs = jnp.where(row >= shift, xs, 0.0)              # causal left pad
        acc = acc + xs * w_ref[k:k + 1, :].astype(jnp.float32)
    acc = acc + b_ref[...].astype(jnp.float32)
    acc = acc * jax.nn.sigmoid(acc)                        # SiLU
    # Zero pad-token positions so they cannot leak into the dense mixing.
    o_ref[0] = (acc * m_ref[0].astype(jnp.float32)).astype(o_ref.dtype)


def mix_kernel(q_ref, k_ref, v_ref, o_ref, *, gheads, dk, hd, scale):
    # Per-head dense mixing: y_h = ((q_h k_h^T) * scale) v_h, scale folded into q.
    q = q_ref[0] * scale                                   # (S, g*dk)
    k = k_ref[0]
    v = v_ref[0]
    dn = (((1,), (1,)), ((), ()))                          # contract last dims
    outs = []
    for h in range(gheads):
        qh = q[:, h * dk:(h + 1) * dk]
        kh = k[:, h * dk:(h + 1) * dk]
        vh = v[:, h * hd:(h + 1) * hd]
        sc = jax.lax.dot_general(qh, kh, dn, preferred_element_type=jnp.float32)
        outs.append(jnp.dot(sc.astype(vh.dtype), vh,
                            preferred_element_type=jnp.float32))
    o_ref[0] = jnp.concatenate(outs, axis=-1).astype(o_ref.dtype)


def gated_rms_matmul_kernel(y_ref, z_ref, g_ref, w_ref, b_ref, o_ref):
    # Gated RMSNorm fused as a prologue of the out_proj matmul (full-K blocks).
    y = y_ref[...].astype(jnp.float32)
    z = z_ref[...].astype(jnp.float32)
    u = y * (z * jax.nn.sigmoid(z))                        # y * SiLU(z)
    ms = jnp.mean(u * u, axis=-1, keepdims=True)
    u = u * jax.lax.rsqrt(ms + RMS_EPS) * g_ref[...].astype(jnp.float32)
    acc = jnp.dot(u.astype(w_ref.dtype), w_ref[...],
                  preferred_element_type=jnp.float32)
    o_ref[...] = (acc + b_ref[...].astype(jnp.float32)).astype(o_ref.dtype)


# -------------------------------- wrappers ----------------------------------- #

def layernorm(x, w, b):
    M, C = x.shape
    tm = _row_tile(M)
    return pl.pallas_call(
        layernorm_kernel,
        grid=(pl.cdiv(M, tm),),
        in_specs=[pl.BlockSpec((tm, C), lambda i: (i, 0)),
                  pl.BlockSpec((1, C), lambda i: (0, 0)),
                  pl.BlockSpec((1, C), lambda i: (0, 0))],
        out_specs=pl.BlockSpec((tm, C), lambda i: (i, 0)),
        out_shape=jax.ShapeDtypeStruct(x.shape, x.dtype),
        compiler_params=pltpu.CompilerParams(dimension_semantics=("parallel",)),
    )(x, w.reshape(1, -1), b.reshape(1, -1))


def add_layernorm(x, res, w, b):
    M, C = x.shape
    tm = _row_tile(M)
    return pl.pallas_call(
        add_layernorm_kernel,
        grid=(pl.cdiv(M, tm),),
        in_specs=[pl.BlockSpec((tm, C), lambda i: (i, 0)),
                  pl.BlockSpec((tm, C), lambda i: (i, 0)),
                  pl.BlockSpec((1, C), lambda i: (0, 0)),
                  pl.BlockSpec((1, C), lambda i: (0, 0))],
        out_specs=pl.BlockSpec((tm, C), lambda i: (i, 0)),
        out_shape=jax.ShapeDtypeStruct(x.shape, x.dtype),
        compiler_params=pltpu.CompilerParams(dimension_semantics=("parallel",)),
    )(x, res, w.reshape(1, -1), b.reshape(1, -1))


def dense(x, w, b):
    """Tiled matmul + bias: grid (M/tm, N/tn, K/tk), f32 accumulator scratch."""
    M, K = x.shape
    N = w.shape[1]
    tm = _row_tile(M, 512)
    tn = _col_tile(N, 512)
    tk = _divisor_tile(K, 512)
    grid = (pl.cdiv(M, tm), pl.cdiv(N, tn), pl.cdiv(K, tk))
    return pl.pallas_call(
        matmul_bias_kernel,
        grid=grid,
        in_specs=[pl.BlockSpec((tm, tk), lambda i, j, k: (i, k)),
                  pl.BlockSpec((tk, tn), lambda i, j, k: (k, j)),
                  pl.BlockSpec((1, tn), lambda i, j, k: (0, j))],
        out_specs=pl.BlockSpec((tm, tn), lambda i, j, k: (i, j)),
        out_shape=jax.ShapeDtypeStruct((M, N), x.dtype),
        scratch_shapes=[pltpu.VMEM((tm, tn), jnp.float32)],
        compiler_params=pltpu.CompilerParams(
            dimension_semantics=("parallel", "parallel", "arbitrary"),
            vmem_limit_bytes=VMEM_LIMIT),
    )(x, w, b.reshape(1, -1))


def dwconv_silu(x, w, b, mask):
    """Causal depthwise conv + SiLU + pad mask; tiled over (batch, channels)."""
    B, S, C = x.shape
    K = w.shape[0]
    tc = _divisor_tile(C, pref=1024, mult=128)
    kern = partial(dwconv_silu_kernel, kconv=K)
    return pl.pallas_call(
        kern,
        grid=(B, C // tc),
        in_specs=[
            pl.BlockSpec((1, S, tc), lambda bb, cc: (bb, 0, cc)),
            pl.BlockSpec((K, tc), lambda bb, cc: (0, cc)),
            pl.BlockSpec((1, tc), lambda bb, cc: (0, cc)),
            pl.BlockSpec((1, S, 1), lambda bb, cc: (bb, 0, 0)),
        ],
        out_specs=pl.BlockSpec((1, S, tc), lambda bb, cc: (bb, 0, cc)),
        out_shape=jax.ShapeDtypeStruct((B, S, C), x.dtype),
        compiler_params=pltpu.CompilerParams(
            dimension_semantics=("parallel", "parallel"),
            vmem_limit_bytes=VMEM_LIMIT),
    )(x, w, b.reshape(1, -1), mask)


def mix(q, k, v, *, nheads, dk, hd):
    """Per-head (QK^T)V mixing; heads grouped per block for lane-dense DMAs."""
    B, S, _ = q.shape
    g = _head_group(nheads, dk, hd)
    scale = (1.0 / math.sqrt(dk)) * (1.0 / S)      # score scale * 1/len, folded into q
    kern = partial(mix_kernel, gheads=g, dk=dk, hd=hd, scale=scale)
    return pl.pallas_call(
        kern,
        grid=(B, nheads // g),
        in_specs=[
            pl.BlockSpec((1, S, g * dk), lambda b, h: (b, 0, h)),
            pl.BlockSpec((1, S, g * dk), lambda b, h: (b, 0, h)),
            pl.BlockSpec((1, S, g * hd), lambda b, h: (b, 0, h)),
        ],
        out_specs=pl.BlockSpec((1, S, g * hd), lambda b, h: (b, 0, h)),
        out_shape=jax.ShapeDtypeStruct((B, S, nheads * hd), q.dtype),
        compiler_params=pltpu.CompilerParams(
            dimension_semantics=("parallel", "parallel"),
            vmem_limit_bytes=VMEM_LIMIT),
    )(q, k, v)


def gated_rms_out_proj(y, z, g, w, b):
    """Gated RMSNorm fused into the out_proj matmul (grid over M, N; full K)."""
    M, K = y.shape
    N = w.shape[1]
    tm = _row_tile(M, 256)
    tn = _col_tile(N, 512)
    grid = (pl.cdiv(M, tm), pl.cdiv(N, tn))
    return pl.pallas_call(
        gated_rms_matmul_kernel,
        grid=grid,
        in_specs=[pl.BlockSpec((tm, K), lambda i, j: (i, 0)),
                  pl.BlockSpec((tm, K), lambda i, j: (i, 0)),
                  pl.BlockSpec((1, K), lambda i, j: (0, 0)),
                  pl.BlockSpec((K, tn), lambda i, j: (0, j)),
                  pl.BlockSpec((1, tn), lambda i, j: (0, j))],
        out_specs=pl.BlockSpec((tm, tn), lambda i, j: (i, j)),
        out_shape=jax.ShapeDtypeStruct((M, N), y.dtype),
        compiler_params=pltpu.CompilerParams(
            dimension_semantics=("parallel", "parallel"),
            vmem_limit_bytes=VMEM_LIMIT),
    )(y, z, g.reshape(1, -1), w, b.reshape(1, -1))


# ------------------------------ mixer module --------------------------------- #

def init_params(key, d_model, d_conv, expand, headdim, qk_dim, dtype=jnp.bfloat16):
    d_inner = expand * d_model
    nheads = d_inner // headdim
    d_conv_ch = d_inner + 2 * nheads * qk_dim        # (xv, q, k) channels
    d_in_proj = d_inner + d_conv_ch                  # z + (xv, q, k)
    ks = jax.random.split(key, 3)
    return {
        "in_proj_w": (0.02 * jax.random.normal(ks[0], (d_model, d_in_proj),
                                               jnp.float32)).astype(dtype),
        "in_proj_b": jnp.zeros((d_in_proj,), dtype),
        "conv_w": (0.1 * jax.random.normal(ks[1], (d_conv, d_conv_ch),
                                           jnp.float32)).astype(dtype),
        "conv_b": jnp.zeros((d_conv_ch,), dtype),
        "rms_w": jnp.ones((d_inner,), dtype),
        "out_proj_w": (0.02 * jax.random.normal(ks[2], (d_inner, d_model),
                                                jnp.float32)).astype(dtype),
        "out_proj_b": jnp.zeros((d_model,), dtype),
        "ln_w": jnp.ones((d_model,), dtype),
        "ln_b": jnp.zeros((d_model,), dtype),
    }


def mixer_forward(p, x_pad, mask_pad, *, headdim, qk_dim):
    # x_pad: (B, S, d_model) padded hidden states; mask_pad: (B, S, 1) {0,1}
    B, S, D = x_pad.shape
    d_inner = p["rms_w"].shape[-1]
    H = d_inner // headdim

    zxqk = dense(x_pad.reshape(B * S, D), p["in_proj_w"], p["in_proj_b"])
    zxqk = zxqk.reshape(B, S, -1)
    z = zxqk[..., :d_inner]
    xqk = zxqk[..., d_inner:]

    # Causal depthwise conv + SiLU; pad tokens zeroed here so they do not leak
    # into the dense (S x S) sequence mixing below.
    xqk = dwconv_silu(xqk, p["conv_w"], p["conv_b"], mask_pad)

    xv = xqk[..., :d_inner]                                  # (B, S, H*headdim)
    q = xqk[..., d_inner:d_inner + H * qk_dim]               # (B, S, H*qk_dim)
    k = xqk[..., d_inner + H * qk_dim:]                      # (B, S, H*qk_dim)

    # Heads stay in channels-last layout; grouping happens via BlockSpecs.
    y = mix(q, k, xv, nheads=H, dk=qk_dim, hd=headdim)       # (B, S, d_inner)

    out = gated_rms_out_proj(y.reshape(B * S, d_inner),
                             z.reshape(B * S, d_inner),
                             p["rms_w"], p["out_proj_w"], p["out_proj_b"])
    return out.reshape(B, S, D)


def bert_unpad_mixer_forward(params, hidden_states, cu_seqlens, max_s,
                             subset_idx=None, indices=None, attn_mask=None,
                             *, is_prenorm=False, headdim=16, qk_dim=16):
    """Mirrors BertUnpadMixer.forward.

    hidden_states: (total_nnz, d_model); cu_seqlens: (batch+1,);
    indices: (total_nnz,) flat positions inside (batch*max_s);
    attn_mask: (batch, max_s).
    """
    batch = cu_seqlens.shape[0] - 1
    d_model = hidden_states.shape[-1]

    residual = hidden_states
    x = hidden_states
    if is_prenorm:
        x = layernorm(x, params["ln_w"], params["ln_b"])

    # pad_input: scatter unpadded tokens into (batch, max_s, d_model).
    # TODO(synk): pad/unpad stays as an XLA scatter/gather; a scalar-prefetch
    #             Pallas gather kernel (PrefetchScalarGridSpec) would remove it.
    padded = jnp.zeros((batch * max_s, d_model), x.dtype).at[indices].set(x)
    padded = padded.reshape(batch, max_s, d_model)

    if attn_mask is not None:
        mask_pad = attn_mask.reshape(batch, max_s, 1).astype(x.dtype)
    else:
        mask_pad = (jnp.zeros((batch * max_s, 1), x.dtype)
                    .at[indices].set(1).reshape(batch, max_s, 1))

    out_pad = mixer_forward(params, padded, mask_pad, headdim=headdim, qk_dim=qk_dim)

    # unpad_input_only: gather rows with the provided indices directly.
    output = out_pad.reshape(batch * max_s, d_model)[indices]

    if is_prenorm:
        output = output + residual
    else:
        output = add_layernorm(output, residual, params["ln_w"], params["ln_b"])

    if subset_idx is not None:
        output = output[subset_idx]          # index_first_axis
    return output


# ---------------------------------- main -------------------------------------- #

if __name__ == "__main__":
    key = jax.random.PRNGKey(0)
    d_model = 32
    d_conv = 4
    expand = 2
    headdim = 16
    qk_dim = 16
    batch = 2
    max_s = 8

    cu_seqlens = jnp.array([0, 8, 14], dtype=jnp.int32)       # seqlens = [8, 6]
    total_nnz = 14
    attn_mask = jnp.array([[1] * 8, [1] * 6 + [0] * 2], dtype=jnp.int32)
    indices = jnp.array(list(range(8)) + list(range(8, 14)), dtype=jnp.int32)
    subset_idx = jnp.array([0, 3, 9], dtype=jnp.int32)

    k_in, k_par = jax.random.split(key)
    hidden_states = jax.random.normal(k_in, (total_nnz, d_model),
                                      jnp.float32).astype(jnp.bfloat16)
    params = init_params(k_par, d_model, d_conv, expand, headdim, qk_dim,
                         dtype=jnp.bfloat16)

    out = bert_unpad_mixer_forward(
        params, hidden_states, cu_seqlens, max_s,
        subset_idx=subset_idx, indices=indices, attn_mask=attn_mask,
        is_prenorm=False, headdim=headdim, qk_dim=qk_dim)
    out = jax.block_until_ready(out)
    assert out.shape == (subset_idx.shape[0], d_model)
    assert bool(jnp.all(jnp.isfinite(out.astype(jnp.float32))))
    print("KERNEL_OK")
</pallas_src>

<mosaic_0001>
module attributes {stable_mosaic.version = 11 : i64} {
  func.func @matmul_bias_kernel(%arg0: i32, %arg1: i32, %arg2: i32, %arg3: memref<16x32xbf16, #tpu.memory_space<vmem>>, %arg4: memref<32x256xbf16, #tpu.memory_space<vmem>>, %arg5: memref<1x256xbf16, #tpu.memory_space<vmem>>, %arg6: memref<16x256xbf16, #tpu.memory_space<vmem>>, %arg7: memref<16x256xf32, #tpu.memory_space<vmem>>) attributes {dimension_semantics = [#tpu.dimension_semantics<parallel>, #tpu.dimension_semantics<parallel>, #tpu.dimension_semantics<arbitrary>], iteration_bounds = array<i64: 1, 1, 1>, scalar_prefetch = 0 : i64, scratch_operands = 1 : i64, tpu.core_type = #tpu.core_type<tc>, window_params = [{transform_indices = @transform_0, window_bounds = array<i64: 16, 32>}, {transform_indices = @transform_1, window_bounds = array<i64: 32, 256>}, {transform_indices = @transform_2, window_bounds = array<i64: 1, 256>}, {transform_indices = @transform_3, window_bounds = array<i64: 16, 256>}]} {
    %c0_i32 = arith.constant 0 : i32
    %0 = arith.cmpi eq, %arg2, %c0_i32 : i32
    %1 = arith.extui %0 : i1 to i32
    %c0_i32_0 = arith.constant 0 : i32
    %2 = arith.cmpi ne, %1, %c0_i32_0 : i32
    scf.if %2 {
      %cst_10 = arith.constant 0.000000e+00 : f32
      %12 = vector.broadcast %cst_10 : f32 to vector<16x256xf32>
      %c0_11 = arith.constant 0 : index
      %c0_12 = arith.constant 0 : index
      %13 = vector.load %arg7[%c0_11, %c0_12] : memref<16x256xf32, #tpu.memory_space<vmem>>, vector<16x256xf32>
      tpu.vector_store %arg7[%c0_11, %c0_12], %12 {strides = array<i32>} : memref<16x256xf32, #tpu.memory_space<vmem>>, vector<16x256xf32>,
    } else {
    }
    %c0 = arith.constant 0 : index
    %c0_1 = arith.constant 0 : index
    %3 = vector.load %arg7[%c0, %c0_1] : memref<16x256xf32, #tpu.memory_space<vmem>>, vector<16x256xf32>
    %c0_2 = arith.constant 0 : index
    %c0_3 = arith.constant 0 : index
    %4 = vector.load %arg3[%c0_2, %c0_3] : memref<16x32xbf16, #tpu.memory_space<vmem>>, vector<16x32xbf16>
    %c0_4 = arith.constant 0 : index
    %c0_5 = arith.constant 0 : index
    %5 = vector.load %arg4[%c0_4, %c0_5] : memref<32x256xbf16, #tpu.memory_space<vmem>>, vector<32x256xbf16>
    %cst = arith.constant dense<0.000000e+00> : vector<16x256xf32>
    %6 = tpu.matmul %4, %5, %cst {dimension_numbers = #tpu.dot_dimension_numbers<[1], [0], [0], [1], [0, 0, 1, 1], [], []>} : vector<16x32xbf16>, vector<32x256xbf16>, vector<16x256xf32> -> vector<16x256xf32>
    %7 = arith.addf %3, %6 : vector<16x256xf32>
    %c0_6 = arith.constant 0 : index
    %c0_7 = arith.constant 0 : index
    %8 = vector.load %arg7[%c0_6, %c0_7] : memref<16x256xf32, #tpu.memory_space<vmem>>, vector<16x256xf32>
    tpu.vector_store %arg7[%c0_6, %c0_7], %7 {strides = array<i32>} : memref<16x256xf32, #tpu.memory_space<vmem>>, vector<16x256xf32>,
    %c0_i32_8 = arith.constant 0 : i32
    %9 = arith.cmpi eq, %arg2, %c0_i32_8 : i32
    %10 = arith.extui %9 : i1 to i32
    %c0_i32_9 = arith.constant 0 : i32
    %11 = arith.cmpi ne, %10, %c0_i32_9 : i32
    scf.if %11 {
      %c0_10 = arith.constant 0 : index
      %c0_11 = arith.constant 0 : index
      %12 = vector.load %arg7[%c0_10, %c0_11] : memref<16x256xf32, #tpu.memory_space<vmem>>, vector<16x256xf32>
      %c0_12 = arith.constant 0 : index
      %c0_13 = arith.constant 0 : index
      %13 = vector.load %arg5[%c0_12, %c0_13] : memref<1x256xbf16, #tpu.memory_space<vmem>>, vector<1x256xbf16>
      %14 = arith.extf %13 : vector<1x256xbf16> to vector<1x256xf32>
      %15 = vector.broadcast %14 : vector<1x256xf32> to vector<16x256xf32>
      %16 = arith.addf %12, %15 : vector<16x256xf32>
      %17 = arith.truncf %16 : vector<16x256xf32> to vector<16x256xbf16>
      %c0_14 = arith.constant 0 : index
      %c0_15 = arith.constant 0 : index
      %18 = vector.load %arg6[%c0_14, %c0_15] : memref<16x256xbf16, #tpu.memory_space<vmem>>, vector<16x256xbf16>
      tpu.vector_store %arg6[%c0_14, %c0_15], %17 {strides = array<i32>} : memref<16x256xbf16, #tpu.memory_space<vmem>>, vector<16x256xbf16>,
    } else {
    }
    return
  }
  func.func @transform_0(%arg0: i32, %arg1: i32, %arg2: i32) -> (i32, i32) {
    %c0_i32 = arith.constant 0 : i32
    return %arg0, %arg2 : i32, i32
  }
  func.func @transform_1(%arg0: i32, %arg1: i32, %arg2: i32) -> (i32, i32) {
    %c0_i32 = arith.constant 0 : i32
    return %arg2, %arg1 : i32, i32
  }
  func.func @transform_2(%arg0: i32, %arg1: i32, %arg2: i32) -> (i32, i32) {
    %c0_i32 = arith.constant 0 : i32
    %c0_i32_0 = arith.constant 0 : i32
    return %c0_i32, %arg1 : i32, i32
  }
  func.func @transform_3(%arg0: i32, %arg1: i32, %arg2: i32) -> (i32, i32) {
    %c0_i32 = arith.constant 0 : i32
    return %arg0, %arg1 : i32, i32
  }
}

</mosaic_0001>

<bundles_post_ra>
// kernel: tpu_custom_call.1
= control target key start
LH: loop header
LB: loop body
LE: loop exit
PB: predicated region body
PF: predicated region fallthrough
CT: control target
= control target key end

     0   :  { %8 = vsyncpa [#allocation4], 0  ;;  %s343_s0 = inlined_call_operand.hbm [shape: bf16[16,32], index: 0, kind: input, shape index: {}]   ;;  %s344_s1 = inlined_call_operand.hbm [shape: bf16[32,256], index: 1, kind: input, shape index: {}]   ;;  %s345_s2 = inlined_call_operand.vmem [shape: bf16[1,256], index: 2, kind: input, shape index: {}]   ;;  %s346_s3 = inlined_call_operand.hbm [shape: bf16[16,256], index: 3, kind: output, shape index: {}]  }
   0x1   :  { %9 = vsyncpa [#allocation7], 0 }
   0x2   :  { %10 = vsyncpa [#allocation5], 0  ;;  %s297_s12 = smov [#allocation3]  }
   0x3   :  { %s16_s13 = sshll.u32 %s297_s12, 4  ;;  %s17_s13 = int_to_ptr.vmem [resolvable:$true] %s16_s13 }
   0x4   :  { %s239_s14 = scalar_lea.vmem %s17_s13, 128  ;;  %p244_p1 = scmp.lt.s32.totalorder %s17_s13, %s17_s13 }
   0x5   :  { %p240_p0 = scmp.ne.s32.totalorder %s17_s13, %s239_s14  ;;  %p245_p2 = scmp.lt.s32.totalorder %s239_s14, %s239_s14 }
   0x7   :  { %p246_p3 = por %p245_p2, %p244_p1 }
   0x9   :  { %p247_p4 = pnand %p246_p3, %p240_p0 }
   0xb   :  { %250 = shalt.err (!%p247_p4)
}
   0xc   :  { %s298_s15 = smov 64   ;;  %s299_s16 = smov 4  }
   0xd   :  { %22 = dma.hbm_to_vmem [thread:$0]  %s343_s0, 128, %s17_s13, [#allocation4], %s298_s15, %s298_s15, %s299_s16  }
   0xe   :  { %s300_s19 = smov [#allocation6]  }
   0xf   :  { %s28_s20 = sshll.u32 %s300_s19, 4  ;;  %s29_s20 = int_to_ptr.vmem [resolvable:$true] %s28_s20 }
  0x10   :  { %s259_s21 = scalar_lea.vmem %s29_s20, 512  ;;  %p264_p6 = scmp.lt.s32.totalorder %s29_s20, %s29_s20 }
  0x11   :  { %p260_p5 = scmp.ne.s32.totalorder %s29_s20, %s259_s21  ;;  %p265_p7 = scmp.lt.s32.totalorder %s259_s21, %s259_s21 }
  0x13   :  { %p266_p8 = por %p265_p7, %p264_p6 }
  0x15   :  { %p267_p9 = pnand %p266_p8, %p260_p5 }
  0x17   :  { %270 = shalt.err (!%p267_p9)
}
  0x18   :  { %s301_s22 = smov 128   ;;  %s302_s23 = smov 8  }
  0x19   :  { %34 = dma.hbm_to_vmem [thread:$0]  %s344_s1, 512, %s29_s20, [#allocation7], %s301_s22, %s301_s22, %s302_s23  }
  0x1a   :  { %291 = dma.done.wait [#allocation4], 128  }
  0x1b   :  { %292 = vsyncadd [#allocation4], 4294967168 }
  0x1c   :  { %293 = dma.done.wait [#allocation7], 512  }
  0x1d   :  { %294 = vsyncadd [#allocation7], 4294966784  ;;  %v303_v0 = vmov 0   ;;  %v224_v1 = vld [vmem:[#allocation6 + $0x14] ss:$8 sps:$4 sm:$0xff]   ;;  %vm87_vm0 = vcmask 261120   ;;  %v152_v6 = vlaneseq }
  0x1e   :  { %123 = vmatprep.mubr.bf16.mxu0 %v303_v0  ;;  %v226_v2 = vld [vmem:[#allocation6 + $0x10] ss:$8 sps:$4 sm:$0xff]   ;;  %103 = vmatprep.subr.bf16.mxu0 %v224_v1  ;;  %v227_v3 = vld [vmem:[#allocation6 + $0x4] ss:$8 sps:$4 sm:$0xff]   ;;  %v229_v4 = vld [vmem:[#allocation6] ss:$8 sps:$4 sm:$0xff]  }
  0x1f   :  { %104 = vmatpush1.bf16.msra.mxu0 %v226_v2  ;;  %v230_v5 = vld [vmem:[#allocation3] sm:$0xff]   ;;  %v153_v7 = vshrl.u32 %v152_v6, 7  ;;  %s304_s26 = smov [#allocation8]  }
  0x20   :  { %105 = vmatprep.subr.bf16.mxu0 %v227_v3  ;;  %v149_v8 = vld [vmem:[%s345_s2] sm:$0x3]  ;;  %s193_s27 = sshll.u32 %s304_s26, 4  ;;  %s194_s27 = int_to_ptr.vmem [resolvable:$true] %s193_s27 }
  0x21   :  { %v150_v9 = vunpack.c.l.bf16 %v149_v8  ;;  %v154_v10 = vsub.s32 0, %v153_v7  ;;  %v158_v11 = vsub.s32 2, %v153_v7  ;;  %s271_s2 = scalar_lea.vmem %s194_s27, 256  ;;  %p276_p11 = scmp.lt.s32.totalorder %s194_s27, %s194_s27 }
  0x22   :  { %p272_p10 = scmp.ne.s32.totalorder %s194_s27, %s271_s2  ;;  %p277_p12 = scmp.lt.s32.totalorder %s271_s2, %s271_s2 }
  0x23   :  { %106 = vmatpush1.bf16.msra.mxu0 %v229_v4  ;;  %v155_v12 = vrot.slane %v150_v9, %v154_v10  ;;  %v159_v13 = vrot.slane %v150_v9, %v158_v11 }
  0x24   :  { %p278_p13 = por %p277_p12, %p276_p11 }
  0x25   :  { %v165_v14 = vrot.slane %v155_v12, %v154_v10  ;;  %v169_v15 = vrot.slane %v159_v13, %v154_v10 }
  0x26   :  { %211 = vmatmul.mubr.msk.bf16.vlgmr.msra.gmra.mxu0 %vm87_vm0, %v230_v5  ;;  %p279_p0 = pnand %p278_p13, %p272_p10 }
  0xe6   :  { %v125_v16 = vpop.f32.mrf.mxu0 }
  0xe7   :  { %v170_v18 = vadd.f32 %v165_v14, %v125_v16 }
  0xe8   :  { %v127_v17 = vpop.f32.mrf.mxu0 }
  0xe9   :  { %v171_v19 = vadd.f32 %v169_v15, %v127_v17 }
  0xea   :  { %v129_v20 = vpop.f32.mrf.mxu0 }
  0xeb   :  { %v214_v21 = vpack.c.bf16 %v171_v19, %v170_v18  ;;  %v172_v23 = vadd.f32 %v165_v14, %v129_v20 }
  0xec   :  { %v131_v22 = vpop.f32.mrf.mxu0 }
  0xed   :  { %186 = vst [vmem:[#allocation8] sm:$0xff] %v214_v21  ;;  %v173_v24 = vadd.f32 %v169_v15, %v131_v22 }
  0xef   :  { %v215_v25 = vpack.c.bf16 %v173_v24, %v172_v23 }
  0xf1   :  { %187 = vst [vmem:[#allocation8 + $0x8] sm:$0xff] %v215_v25 }
  0xf2   :  { %282 = shalt.err (!%p279_p0)
}
  0xf3   :  { %199 = dma.vmem_to_hbm [thread:$0]  %s194_s27, 256, %s346_s3, [#allocation5], %s301_s22, %s301_s22, %s302_s23  }
  0xf4   :  { %295 = dma.done.wait [#allocation5], 256  }
  0xf5   :  { %296 = vsyncadd [#allocation5], 4294967040 }
  0xf6   :  { %203 = vsyncpa [#allocation4], 1 }
  0xf7   :  { %204 = vsyncpa [#allocation7], 1 }
  0xf8   :  { %205 = vsyncpa [#allocation5], 1 }

</bundles_post_ra>
